<compile_context>
chip_gen: v6e
topology: v6e:2x2x1
jax: 0.10.0
libtpu: 0.0.40
codegen_flags: <defaults>
</compile_context>

<pallas_src>
import functools

import jax
import jax.numpy as jnp
from jax.experimental import pallas as pl
from jax.experimental.pallas import tpu as pltpu

TEMP = 0.5      # ContrastiveLoss(temp=0.5) default
COS_EPS = 1e-8  # nn.CosineSimilarity eps default
NEG_INF = -1e30


def _round_up(n, m):
    return ((n + m - 1) // m) * m


def _default_row_tile():
    # v5e (and older) MXU is 128-wide -> TB=128 costs nothing there and halves
    # the (TB, Bp) f32 softmax temporaries; v6e/v7x MXU is 256-wide -> TB=256.
    try:
        kind = jax.devices()[0].device_kind.lower()
    except Exception:
        return 256
    for old in ("v2", "v3", "v4", "v5"):
        if old in kind:
            return 128
    return 256


def _vmem_cap_bytes():
    # Cap the requested scoped-VMEM at ~85% of physical (v7x: 64 MiB/TC).
    try:
        return int(0.85 * pltpu.get_tpu_info().vmem_capacity_bytes)
    except Exception:
        return 48 * 1024 * 1024


def _vmem_estimate(tb, bp, dp, x_item, k_item):
    return (2 * tb * dp * x_item        # streamed query tiles (double buffered)
            + bp * dp * k_item          # resident normalized keys (Buffered(1))
            + bp * 4 + 2 * tb * 4       # column mask + per-row output blocks
            + 6 * tb * bp * 4           # f32 sim / exp temporaries
            + 4 * tb * dp * 4           # f32 query-normalization temporaries
            + (2 << 20))                # slack


def _contrastive_loss_kernel(x_ref, yhat_ref, cmask_ref, o_ref, *,
                             tile_rows, inv_temp, masked, precision):
    i = pl.program_id(0)

    # ---- normalize the query tile in f32 (rsqrt -> EUP), fold 1/temp in ----
    # NOTE: per-vector norm clamp (||x|| >= eps, ||y|| >= eps) instead of
    # torch's clamp on the norm *product*; only differs for near-zero vectors.
    xf = x_ref[...].astype(jnp.float32)                              # (TB, Dp)
    x_sq = jnp.sum(xf * xf, axis=-1, keepdims=True)
    inv_xn = jax.lax.rsqrt(jnp.maximum(x_sq, COS_EPS * COS_EPS))
    x_hat_f32 = xf * (inv_xn * inv_temp)                             # (TB, Dp)
    x_hat = x_hat_f32.astype(yhat_ref.dtype)                         # matmul dtype

    # ---- sim = x_hat @ y_hat^T on the MXU (contract last dims, f32 acc) ----
    sim = jax.lax.dot_general(
        x_hat, yhat_ref[...],
        dimension_numbers=(((1,), (1,)), ((), ())),
        preferred_element_type=jnp.float32,
        precision=precision)                                          # (TB, Bp)

    if masked:  # static branch: one add/elem keeps padded key columns out
        sim = sim + cmask_ref[...]                                    # (1, Bp) bcast

    # ---- positive logit: rowwise dot with the row-aligned resident key slice ----
    start = pl.multiple_of(i * tile_rows, tile_rows)
    y_tile = yhat_ref[pl.ds(start, tile_rows), :].astype(jnp.float32)  # (TB, Dp)
    diag = jnp.sum(x_hat_f32 * y_tile, axis=-1, keepdims=True)         # (TB, 1)

    # ---- rowwise cross entropy with labels = arange(B): lse - sim[i,i] ----
    m = jnp.max(sim, axis=-1, keepdims=True)
    lse = m + jnp.log(jnp.sum(jnp.exp(sim - m), axis=-1, keepdims=True))
    o_ref[...] = lse - diag                                            # (TB, 1)


def contrastive_loss(node_emb, img_emb, temp=TEMP, use_bf16_matmul=False):
    """node_emb, img_emb: (B, D) arrays of the same dtype. Returns scalar f32 loss."""
    B, D = node_emb.shape
    assert img_emb.shape == (B, D)
    assert node_emb.dtype == img_emb.dtype

    x_item = jnp.dtype(node_emb.dtype).itemsize
    mm_dtype = node_emb.dtype
    if use_bf16_matmul and mm_dtype == jnp.float32:
        mm_dtype = jnp.bfloat16          # MXU-native; accumulation & diag stay f32
    k_item = jnp.dtype(mm_dtype).itemsize

    # Sublane quantum for the narrowest padded dtype (8 f32 / 16 bf16 / 32 int8).
    sub = max(8, 32 // min(x_item, k_item))
    Dp = _round_up(D, 128)

    TB = _round_up(min(_default_row_tile(), _round_up(B, sub)), sub)
    cap = _vmem_cap_bytes()
    while TB > sub and _vmem_estimate(TB, _round_up(B, TB), Dp, x_item, k_item) > cap:
        TB = _round_up(max(sub, TB // 2), sub)
    Bp = _round_up(B, TB)
    nt = Bp // TB
    masked = Bp != B
    est = _vmem_estimate(TB, Bp, Dp, x_item, k_item)
    vmem_limit = int(min(max(est, 16 * 1024 * 1024), cap))
    # TODO(synk): for very large B (resident normalized keys / (TB,Bp) f32
    # temporaries exceed VMEM), add a key-column grid axis with a flash-style
    # online-softmax accumulator instead of resident keys.

    # Pre-normalize keys once outside the grid (keeps the grid axis "parallel":
    # no cross-tile init), then pad rows/cols to the tile quanta with zeros.
    yf = img_emb.astype(jnp.float32)
    yn = jnp.sqrt(jnp.sum(yf * yf, axis=-1, keepdims=True))
    yhat = (yf / jnp.maximum(yn, COS_EPS)).astype(mm_dtype)

    x = node_emb
    if (Bp, Dp) != (B, D):
        x = jnp.pad(x, ((0, Bp - B), (0, Dp - D)))
        yhat = jnp.pad(yhat, ((0, Bp - B), (0, Dp - D)))

    # Additive 0 / -inf mask for padded key columns (used only when masked).
    cmask = jnp.where(jnp.arange(Bp) < B, 0.0, NEG_INF).astype(jnp.float32)[None, :]

    precision = jax.lax.Precision.HIGHEST if mm_dtype == jnp.float32 else None
    kernel = functools.partial(
        _contrastive_loss_kernel,
        tile_rows=TB, inv_temp=1.0 / float(temp), masked=masked, precision=precision)

    grid_spec = pltpu.PrefetchScalarGridSpec(
        num_scalar_prefetch=0,
        grid=(nt,),
        in_specs=[
            pl.BlockSpec((TB, Dp), lambda i: (i, 0)),            # streamed query rows
            pl.BlockSpec((Bp, Dp), lambda i: (0, 0),
                         pipeline_mode=pl.Buffered(1)),          # resident keys (1x VMEM)
            pl.BlockSpec((1, Bp), lambda i: (0, 0),
                         pipeline_mode=pl.Buffered(1)),          # column mask
        ],
        out_specs=pl.BlockSpec((TB, 1), lambda i: (i, 0)),       # per-row losses
    )

    per_row = pl.pallas_call(
        kernel,
        out_shape=jax.ShapeDtypeStruct((Bp, 1), jnp.float32),
        grid_spec=grid_spec,
        compiler_params=pltpu.CompilerParams(
            # Per-tile independent outputs -> row-tile axis is parallel (megacore on v7x).
            dimension_semantics=("parallel",),
            vmem_limit_bytes=vmem_limit,
        ),
    )(x, yhat, cmask)

    # Padded query rows are finite but invalid; drop them, then mean over B.
    return jnp.sum(per_row[:B, 0]) / B


def contrastive_loss_ref(node_emb, img_emb, temp=TEMP):
    """Pure-JAX reference (mirrors the PyTorch forward)."""
    x = node_emb.astype(jnp.float32)
    y = img_emb.astype(jnp.float32)
    xn = jnp.linalg.norm(x, axis=-1, keepdims=True)
    yn = jnp.linalg.norm(y, axis=-1, keepdims=True)
    sim = (x @ y.T) / jnp.maximum(xn * yn.T, COS_EPS) / temp
    logp = sim - jax.scipy.special.logsumexp(sim, axis=-1, keepdims=True)
    return -jnp.mean(jnp.diagonal(logp))


if __name__ == "__main__":
    key = jax.random.PRNGKey(0)

    # Toy shape consistent with (batch, hidden) embeddings.
    B, D = 8, 32
    k1, k2 = jax.random.split(key)
    node_emb = jax.random.normal(k1, (B, D), dtype=jnp.float32)
    img_emb = jax.random.normal(k2, (B, D), dtype=jnp.float32)
    loss = contrastive_loss(node_emb, img_emb)
    jax.block_until_ready(loss)
    ref = contrastive_loss_ref(node_emb, img_emb)
    assert jnp.allclose(loss, ref, atol=5e-3, rtol=5e-3), (loss, ref)

    # Unaligned shape: exercises row/column padding + the additive column mask.
    B2, D2 = 10, 40
    k3, k4 = jax.random.split(k2)
    node2 = jax.random.normal(k3, (B2, D2), dtype=jnp.float32)
    img2 = jax.random.normal(k4, (B2, D2), dtype=jnp.float32)
    loss2 = contrastive_loss(node2, img2)
    jax.block_until_ready(loss2)
    ref2 = contrastive_loss_ref(node2, img2)
    assert jnp.allclose(loss2, ref2, atol=5e-3, rtol=5e-3), (loss2, ref2)

    # Multi-tile batch: exercises nt > 1, the parallel row-tile axis, and the
    # dynamic row-aligned key slice for the positive logit.
    B3, D3 = 320, 48
    k5, k6 = jax.random.split(k4)
    node3 = jax.random.normal(k5, (B3, D3), dtype=jnp.float32)
    img3 = jax.random.normal(k6, (B3, D3), dtype=jnp.float32)
    loss3 = contrastive_loss(node3, img3)
    jax.block_until_ready(loss3)
    ref3 = contrastive_loss_ref(node3, img3)
    assert jnp.allclose(loss3, ref3, atol=5e-3, rtol=5e-3), (loss3, ref3)

    print("KERNEL_OK")
</pallas_src>

<mosaic_0001>
module attributes {stable_mosaic.version = 11 : i64} {
  func.func @_contrastive_loss_kernel(%arg0: i32, %arg1: memref<8x128xf32, #tpu.memory_space<vmem>>, %arg2: memref<8x128xf32, #tpu.memory_space<vmem>>, %arg3: memref<1x8xf32, #tpu.memory_space<vmem>>, %arg4: memref<8x1xf32, #tpu.memory_space<vmem>>) attributes {dimension_semantics = [#tpu.dimension_semantics<parallel>], iteration_bounds = array<i64: 1>, scalar_prefetch = 0 : i64, scratch_operands = 0 : i64, tpu.core_type = #tpu.core_type<tc>, window_params = [{transform_indices = @transform_0, window_bounds = array<i64: 8, 128>}, {pipeline_mode = #tpu.pipeline_mode<synchronous>, transform_indices = @transform_1, window_bounds = array<i64: 8, 128>}, {pipeline_mode = #tpu.pipeline_mode<synchronous>, transform_indices = @transform_2, window_bounds = array<i64: 1, 8>}, {transform_indices = @transform_3, window_bounds = array<i64: 8, 1>}]} {
    %c0 = arith.constant 0 : index
    %c0_0 = arith.constant 0 : index
    %0 = vector.load %arg1[%c0, %c0_0] : memref<8x128xf32, #tpu.memory_space<vmem>>, vector<8x128xf32>
    %1 = arith.mulf %0, %0 : vector<8x128xf32>
    %cst = arith.constant dense<0.000000e+00> : vector<8xf32>
    %2 = vector.multi_reduction <add>, %1, %cst [1] : vector<8x128xf32> to vector<8xf32>
    %3 = vector.shape_cast %2 : vector<8xf32> to vector<8x1xf32>
    %cst_1 = arith.constant 1.000000e-16 : f32
    %4 = vector.broadcast %cst_1 : f32 to vector<8x1xf32>
    %5 = arith.maximumf %3, %4 : vector<8x1xf32>
    %6 = math.rsqrt %5 : vector<8x1xf32>
    %cst_2 = arith.constant 2.000000e+00 : f32
    %7 = vector.broadcast %cst_2 : f32 to vector<8x1xf32>
    %8 = arith.mulf %6, %7 : vector<8x1xf32>
    %9 = vector.broadcast %8 : vector<8x1xf32> to vector<8x128xf32>
    %10 = arith.mulf %0, %9 : vector<8x128xf32>
    %c0_3 = arith.constant 0 : index
    %c0_4 = arith.constant 0 : index
    %11 = vector.load %arg2[%c0_3, %c0_4] : memref<8x128xf32, #tpu.memory_space<vmem>>, vector<8x128xf32>
    %cst_5 = arith.constant dense<0.000000e+00> : vector<8x8xf32>
    %12 = tpu.matmul %10, %11, %cst_5 {dimension_numbers = #tpu.dot_dimension_numbers<[1], [1], [0], [0], [0, 0, 1, 0], [], []>, precision = #tpu.contract_precision<fp32>} : vector<8x128xf32>, vector<8x128xf32>, vector<8x8xf32> -> vector<8x8xf32>
    %c8_i32 = arith.constant 8 : i32
    %13 = arith.muli %arg0, %c8_i32 : i32
    %14 = tpu.assume_multiple %13, 8 : i32
    %15 = arith.index_cast %14 : i32 to index
    %c0_6 = arith.constant 0 : index
    %16 = vector.load %arg2[%15, %c0_6] : memref<8x128xf32, #tpu.memory_space<vmem>>, vector<8x128xf32>
    %17 = arith.mulf %10, %16 : vector<8x128xf32>
    %cst_7 = arith.constant dense<0.000000e+00> : vector<8xf32>
    %18 = vector.multi_reduction <add>, %17, %cst_7 [1] : vector<8x128xf32> to vector<8xf32>
    %19 = vector.shape_cast %18 : vector<8xf32> to vector<8x1xf32>
    %cst_8 = arith.constant dense<0xFF800000> : vector<8xf32>
    %20 = vector.multi_reduction <maximumf>, %12, %cst_8 [1] : vector<8x8xf32> to vector<8xf32>
    %21 = vector.shape_cast %20 : vector<8xf32> to vector<8x1xf32>
    %22 = vector.broadcast %21 : vector<8x1xf32> to vector<8x8xf32>
    %23 = arith.subf %12, %22 : vector<8x8xf32>
    %24 = math.exp %23 : vector<8x8xf32>
    %cst_9 = arith.constant dense<0.000000e+00> : vector<8xf32>
    %25 = vector.multi_reduction <add>, %24, %cst_9 [1] : vector<8x8xf32> to vector<8xf32>
    %26 = vector.shape_cast %25 : vector<8xf32> to vector<8x1xf32>
    %27 = math.log %26 : vector<8x1xf32>
    %28 = arith.addf %21, %27 : vector<8x1xf32>
    %29 = arith.subf %28, %19 : vector<8x1xf32>
    %c0_10 = arith.constant 0 : index
    %c0_11 = arith.constant 0 : index
    %30 = vector.load %arg4[%c0_10, %c0_11] : memref<8x1xf32, #tpu.memory_space<vmem>>, vector<8x1xf32>
    tpu.vector_store %arg4[%c0_10, %c0_11], %29 {strides = array<i32>} : memref<8x1xf32, #tpu.memory_space<vmem>>, vector<8x1xf32>,
    return
  }
  func.func @transform_0(%arg0: i32) -> (i32, i32) {
    %c0_i32 = arith.constant 0 : i32
    %c0_i32_0 = arith.constant 0 : i32
    return %arg0, %c0_i32 : i32, i32
  }
  func.func @transform_1(%arg0: i32) -> (i32, i32) {
    %c0_i32 = arith.constant 0 : i32
    %c0_i32_0 = arith.constant 0 : i32
    %c0_i32_1 = arith.constant 0 : i32
    return %c0_i32, %c0_i32_0 : i32, i32
  }
  func.func @transform_2(%arg0: i32) -> (i32, i32) {
    %c0_i32 = arith.constant 0 : i32
    %c0_i32_0 = arith.constant 0 : i32
    %c0_i32_1 = arith.constant 0 : i32
    return %c0_i32, %c0_i32_0 : i32, i32
  }
  func.func @transform_3(%arg0: i32) -> (i32, i32) {
    %c0_i32 = arith.constant 0 : i32
    %c0_i32_0 = arith.constant 0 : i32
    return %arg0, %c0_i32 : i32, i32
  }
}

</mosaic_0001>

<bundles_post_ra>
// kernel: tpu_custom_call.1
= control target key start
LH: loop header
LB: loop body
LE: loop exit
PB: predicated region body
PF: predicated region fallthrough
CT: control target
= control target key end

     0   :  { %8 = vsyncpa [#allocation3], 0  ;;  %s661_s0 = inlined_call_operand.hbm [shape: f32[8,128], index: 0, kind: input, shape index: {}]   ;;  %s662_s1 = inlined_call_operand.hbm [shape: f32[8,128], index: 1, kind: input, shape index: {}]   ;;  %s663_s2 = inlined_call_operand.vmem [shape: f32[1,8], index: 2, kind: input, shape index: {}]   ;;  %s664_s3 = inlined_call_operand.vmem [shape: f32[8,1], index: 3, kind: output, shape index: {}]  }
   0x1   :  { %9 = vsyncpa [#allocation5], 0  ;;  %s617_s12 = smov [#allocation2]   ;;  %s618_s14 = smov [#allocation4]  }
   0x2   :  { %s16_s13 = sshll.u32 %s617_s12, 4  ;;  %s26_s15 = sshll.u32 %s618_s14, 4  ;;  %s17_s13 = int_to_ptr.vmem [resolvable:$true] %s16_s13  ;;  %s27_s15 = int_to_ptr.vmem [resolvable:$true] %s26_s15 }
   0x3   :  { %s581_s16 = scalar_lea.vmem %s17_s13, 128  ;;  %p586_p1 = scmp.lt.s32.totalorder %s17_s13, %s17_s13 }
   0x4   :  { %p582_p0 = scmp.ne.s32.totalorder %s17_s13, %s581_s16  ;;  %p587_p2 = scmp.lt.s32.totalorder %s581_s16, %s581_s16 }
   0x6   :  { %p588_p3 = por %p587_p2, %p586_p1 }
   0x8   :  { %p589_p4 = pnand %p588_p3, %p582_p0 }
   0xa   :  { %592 = shalt.err (!%p589_p4)
}
   0xb   :  { %19 = dma.hbm_to_vmem [thread:$0]  %s661_s0, 128, %s17_s13, [#allocation3]  }
   0xc   :  { %s601_s18 = scalar_lea.vmem %s27_s15, 128  ;;  %p606_p6 = scmp.lt.s32.totalorder %s27_s15, %s27_s15 }
   0xd   :  { %p602_p5 = scmp.ne.s32.totalorder %s27_s15, %s601_s18  ;;  %p607_p7 = scmp.lt.s32.totalorder %s601_s18, %s601_s18 }
   0xf   :  { %p608_p8 = por %p607_p7, %p606_p6 }
  0x11   :  { %p609_p9 = pnand %p608_p8, %p602_p5 }
  0x13   :  { %612 = shalt.err (!%p609_p9)
}
  0x14   :  { %29 = dma.hbm_to_vmem [thread:$0]  %s662_s1, 128, %s27_s15, [#allocation5]  }
  0x15   :  { %613 = dma.done.wait [#allocation3], 128  }
  0x16   :  { %614 = vsyncadd [#allocation3], 4294967168 }
  0x17   :  { %615 = dma.done.wait [#allocation5], 128  }
  0x18   :  { %616 = vsyncadd [#allocation5], 4294967168  ;;  %v38_v0 = vld [vmem:[#allocation2] sm:$0xff]  ;;  %v647_v2 = vld [vmem:[#allocation4] sm:$0xff]  ;;  %v619_v8 = vmov 0.0   ;;  %vm620_vm0 = vmmov 0  }
  0x19   :  { %v39_v1 = vmul.f32 %v38_v0, %v38_v0  ;;  %v78_v3 = vand.u32 4294901760, %v647_v2  ;;  %538 = vmatprep.subr.mxu1 %v619_v8  ;;  %533 = vmatprep.subr.mxu0 %v619_v8  ;;  %vm499_vm1 = vcmask 64512   ;;  %vm513_vm2 = vcmask 7168  }
  0x1a   :  { %540 = vmatprep.mubr.msk.f32.mxu1 %vm620_vm0, %v619_v8  ;;  %535 = vmatprep.mubr.msk.f32.mxu0 %vm620_vm0, %v619_v8 }
  0x1b   :  { %40 = vadd.xlane.f32.xlu0 %v39_v1  ;;  %v155_v4 = vsub.f32 %v647_v2, %v78_v3  ;;  %534 = vmatpush3.xpose.msra.mxu0 %v78_v3 }
  0x1c   :  { %543 = vmatprep.subr.mxu0 %v619_v8 }
  0x1d   :  { %v156_v5 = vand.u32 4294901760, %v155_v4 }
  0x1f   :  { %v157_v6 = vsub.f32 %v155_v4, %v156_v5 }
  0x21   :  { %v158_v7 = vand.u32 4294901760, %v157_v6 }
  0x23   :  { %539 = vmatpush3.xpose.msra.mxu1 %v158_v7 }
  0x24   :  { %548 = vmatprep.subr.mxu1 %v619_v8 }
  0xa4   :  { %v41_v9 = vpop.xlane.xlu0 %40 }
  0xa5   :  { %v42_v10 = vmax.f32 %v41_v9, 1e-16 }
  0xa7   :  { %567 = vrsqrt.f32 %v42_v10 }
  0xb4   :  { %v568_v11 = vpop.eup %567 }
  0xb5   :  { %v44_v12 = vmul.f32 2.0, %v568_v11 }
  0xb7   :  { %v45_v13 = vmul.f32 %v44_v12, %v38_v0 }
  0xb9   :  { %v113_v14 = vand.u32 4294901760, %v45_v13  ;;  %v496_v42 = vmul.f32 %v647_v2, %v45_v13 }
  0xbb   :  { %541 = vmatmul.mubr.f32.vlgmr.msra.gmra.mxu1 %v113_v14  ;;  %v114_v15 = vsub.f32 %v45_v13, %v113_v14 }
  0xbc   :  { %549 = vmatpush3.xpose.msra.mxu1 %v78_v3  ;;  %550 = vmatprep.mubr.msk.f32.mxu1 %vm620_vm0, %v619_v8 }
  0xbd   :  { %v115_v16 = vand.u32 4294901760, %v114_v15  ;;  %558 = vmatprep.subr.mxu1 %v619_v8 }
  0xbf   :  { %551 = vmatmul.mubr.f32.vlgmr.msra.gmra.mxu1 %v115_v16  ;;  %v116_v17 = vsub.f32 %v114_v15, %v115_v16 }
  0xc0   :  { %559 = vmatpush3.xpose.msra.mxu1 %v78_v3  ;;  %560 = vmatprep.mubr.msk.f32.mxu1 %vm620_vm0, %v619_v8 }
  0xc1   :  { %v117_v18 = vand.u32 4294901760, %v116_v17 }
  0xc3   :  { %536 = vmatmul.mubr.f32.vlgmr.msra.gmra.mxu0 %v117_v18  ;;  %561 = vmatmul.mubr.f32.vlgmr.msra.gmra.mxu1 %v113_v14 }
  0xc4   :  { %544 = vmatpush3.xpose.msra.mxu0 %v155_v4  ;;  %545 = vmatprep.mubr.msk.f32.mxu0 %vm620_vm0, %v619_v8 }
  0xc5   :  { %553 = vmatprep.subr.mxu0 %v619_v8 }
  0xc7   :  { %546 = vmatmul.mubr.f32.vlgmr.msra.gmra.mxu0 %v114_v15 }
  0xc8   :  { %554 = vmatpush3.xpose.msra.mxu0 %v156_v5  ;;  %555 = vmatprep.mubr.msk.f32.mxu0 %vm620_vm0, %v619_v8 }
  0xcb   :  { %556 = vmatmul.mubr.f32.vlgmr.msra.gmra.mxu0 %v113_v14 }
 0x17b   :  { %v195_v19 = vpop.f32.mrf.mxu1 }
 0x17d   :  { %v542_v20 = vpop.f32.mrf.mxu1 }
 0x17f   :  { %v343_v21 = vpop.f32.mrf.mxu1 }
 0x181   :  { %v552_v22 = vpop.f32.mrf.mxu1 }
 0x183   :  { %v119_v23 = vpop.f32.mrf.mxu0  ;;  %v489_v24 = vpop.f32.mrf.mxu1 }
 0x184   :  { %v196_v27 = vadd.f32 %v195_v19, %v119_v23 }
 0x185   :  { %v537_v25 = vpop.f32.mrf.mxu0  ;;  %v562_v26 = vpop.f32.mrf.mxu1 }
 0x187   :  { %v269_v28 = vpop.f32.mrf.mxu0 }
 0x188   :  { %v270_v29 = vadd.f32 %v269_v28, %v196_v27 }
 0x189   :  { %v547_v30 = vpop.f32.mrf.mxu0 }
 0x18a   :  { %v344_v31 = vadd.f32 %v343_v21, %v270_v29 }
 0x18b   :  { %v417_v32 = vpop.f32.mrf.mxu0 }
 0x18c   :  { %v418_v33 = vadd.f32 %v417_v32, %v344_v31 }
 0x18d   :  { %v557_v34 = vpop.f32.mrf.mxu0 }
 0x18e   :  { %v490_v35 = vadd.f32 %v489_v24, %v418_v33 }
 0x190   :  { %v500_v36 = vsel %vm499_vm1, %v490_v35, -inf }
 0x191   :  { %501 = vmax.xlane.f32.xlu0 %v500_v36 }
 0x21a   :  { %v502_v37 = vpop.xlane.xlu0 %501 }
 0x21b   :  { %v503_v38 = vsub.f32 %v490_v35, %v502_v37 }
 0x21d   :  { %v504_v39 = vmul.f32 1.442695, %v503_v38 }
 0x21f   :  { %569 = vpow2.f32 %v504_v39 }
 0x22c   :  { %v570_v40 = vpop.eup %569 }
 0x22d   :  { %v506_v41 = vsel %vm499_vm1, %v570_v40, 0.0 }
 0x22e   :  { %507 = vadd.xlane.f32.xlu1 %v506_v41 }
 0x232   :  { %497 = vadd.xlane.f32.xlu1 %v496_v42 }
 0x2b7   :  { %v508_v43 = vpop.xlane.xlu1 %507 }
 0x2b8   :  { %571 = vlog2.f32 %v508_v43 }
 0x2bb   :  { %v498_v47 = vpop.xlane.xlu1 %497 }
 0x2c5   :  { %v572_v44 = vpop.eup %571 }
 0x2c6   :  { %v510_v45 = vmul.f32 0.6931472, %v572_v44 }
 0x2c8   :  { %v511_v46 = vadd.f32 %v510_v45, %v502_v37 }
 0x2ca   :  { %v512_v48 = vsub.f32 %v511_v46, %v498_v47 }
 0x2cc   :  { %514 = vst.msk [vmem:[%s664_s3] sm:$0xff] %vm513_vm2, %v512_v48 }
 0x2cd   :  { %519 = vsyncpa [#allocation3], 1 }
 0x2ce   :  { %520 = vsyncpa [#allocation5], 1 }

</bundles_post_ra>
